<compile_context>
chip_gen: v7x
topology: tpu7x:2x2x1
jax: 0.10.0
libtpu: 0.0.40
codegen_flags: <defaults>
</compile_context>

<pallas_src>
import jax
import jax.numpy as jnp
import numpy as np
from jax.experimental import pallas as pl
from jax.experimental.pallas import tpu as pltpu


# ----------------------------- Pallas kernel --------------------------------
def _make_kernel(n_object):
    def kernel(rg_ref, obj_ref, ogoal_ref,
               w1rob_ref, w1o_ref, w1og_ref, w2_ref, w3_ref, bias_ref,
               out_ref):
        bias = bias_ref[...]                       # (3, H)
        b1 = bias[0:1, :]
        b2 = bias[1:2, :]
        b3 = bias[2:3, :]

        w1o = w1o_ref[...]                         # (od, H)
        w1og = w1og_ref[...]                       # (od, H)
        w2 = w2_ref[...]                           # (H, H)
        w3 = w3_ref[...]                           # (H, H)

        # Per-sample (robot_obs ++ robot_goals) contribution to layer 1.
        # Shared by every object of the sample, so compute it once per block.
        base = jnp.dot(rg_ref[...], w1rob_ref[...],
                       preferred_element_type=jnp.float32) + b1   # (B_TILE, H)

        acc = jnp.zeros_like(base)                 # running sum over objects
        for n in range(n_object):                  # static, unrolled (n_object is small)
            h = base \
                + jnp.dot(obj_ref[n], w1o, preferred_element_type=jnp.float32) \
                + jnp.dot(ogoal_ref[n], w1og, preferred_element_type=jnp.float32)
            h = jnp.maximum(h, 0.0)
            h = jnp.maximum(jnp.dot(h, w2, preferred_element_type=jnp.float32) + b2, 0.0)
            h = jnp.maximum(jnp.dot(h, w3, preferred_element_type=jnp.float32) + b3, 0.0)
            acc = acc + h

        out_ref[...] = acc * (1.0 / n_object)      # mean over object axis
    return kernel


def _pick_batch_tile(B, b_tile_cap=256):
    """Batch tile: sublane-aligned, M large, and >=2 grid steps when B is big enough
    (so v7x megacore can shard the 'parallel' axis across its two TensorCores)."""
    if B <= 16:
        return B                                   # single small block (full-dim is legal)
    bt = min(b_tile_cap, -(-B // 2))               # at least 2 grid steps
    bt = max(8, ((bt + 7) // 8) * 8)               # multiple of 8 sublanes
    return bt


# ------------------------------- wrapper -------------------------------------
def deep_set_extractor_forward(robot_obs, object_obs, robot_goals, object_goals,
                               p, b_tile_cap=256):
    B, N, od = object_obs.shape
    rd = robot_obs.shape[-1]
    H = p["w2"].shape[0]
    assert p["w1"].shape[0] == 2 * (rd + od)

    # --- cheap host-side prep; never materializes the tiled (B, N, Din) tensor ---
    rg = jnp.concatenate([robot_obs, robot_goals], axis=-1)         # (B, 2*rd)
    obj_t = jnp.transpose(object_obs, (1, 0, 2))                    # (N, B, od)
    ogoal_t = jnp.transpose(object_goals, (1, 0, 2))                # (N, B, od)

    # Split W1's rows according to the concat order [robot, object, robot_goal, object_goal]
    # and regroup so the kernel does 3 contractions instead of one over a materialized concat.
    w1 = p["w1"]
    w1_rob = jnp.concatenate([w1[0:rd], w1[rd + od:2 * rd + od]], axis=0)   # (2*rd, H)
    w1_o = w1[rd:rd + od]                                                   # (od, H)
    w1_og = w1[2 * rd + od:]                                                # (od, H)
    bias = jnp.stack([p["b1"].reshape(H), p["b2"].reshape(H), p["b3"].reshape(H)], axis=0)  # (3, H)

    bt = _pick_batch_tile(B, b_tile_cap)
    grid = (pl.cdiv(B, bt),)

    def full_spec(a):
        nd = a.ndim
        return pl.BlockSpec(a.shape, lambda i, _nd=nd: (0,) * _nd)

    in_specs = [
        pl.BlockSpec((bt, 2 * rd), lambda i: (i, 0)),        # rg
        pl.BlockSpec((N, bt, od), lambda i: (0, i, 0)),      # obj_t
        pl.BlockSpec((N, bt, od), lambda i: (0, i, 0)),      # ogoal_t
        full_spec(w1_rob), full_spec(w1_o), full_spec(w1_og),
        full_spec(p["w2"]), full_spec(p["w3"]), full_spec(bias),
    ]
    out_spec = pl.BlockSpec((bt, H), lambda i: (i, 0))

    out = pl.pallas_call(
        _make_kernel(N),
        out_shape=jax.ShapeDtypeStruct((B, H), jnp.float32),
        grid_spec=pltpu.PrefetchScalarGridSpec(
            num_scalar_prefetch=0,
            grid=grid,
            in_specs=in_specs,
            out_specs=out_spec),
        compiler_params=pltpu.CompilerParams(
            dimension_semantics=("parallel",)),
    )(rg, obj_t, ogoal_t, w1_rob, w1_o, w1_og, p["w2"], p["w3"], bias)
    return out


# ---------------- pure-JAX reference (mirrors the PyTorch module) -------------
def reference_forward(robot_obs, object_obs, robot_goals, object_goals, p):
    P = jax.lax.Precision.HIGHEST
    N = object_obs.shape[1]
    x = jnp.concatenate(
        [jnp.repeat(robot_obs[:, None, :], N, axis=1),
         object_obs,
         jnp.repeat(robot_goals[:, None, :], N, axis=1),
         object_goals], axis=-1)
    h = jnp.maximum(jnp.matmul(x, p["w1"], precision=P) + p["b1"], 0.0)
    h = jnp.maximum(jnp.matmul(h, p["w2"], precision=P) + p["b2"], 0.0)
    h = jnp.maximum(jnp.matmul(h, p["w3"], precision=P) + p["b3"], 0.0)
    return h.mean(axis=1)


def init_params(key, din, H):
    keys = jax.random.split(key, 6)

    def w(k, shape):
        return jax.random.normal(k, shape, jnp.float32) * 0.1

    # Linear weights kept as (in_dim, out_dim): kernel computes x @ W + b
    return {
        "w1": w(keys[0], (din, H)), "b1": w(keys[1], (1, H)),
        "w2": w(keys[2], (H, H)),   "b2": w(keys[3], (1, H)),
        "w3": w(keys[4], (H, H)),   "b3": w(keys[5], (1, H)),
    }


if __name__ == "__main__":
    B, robot_dim, object_dim, n_object, hidden_size = 4, 7, 9, 3, 32

    key = jax.random.PRNGKey(0)
    k1, k2, k3, k4, k5 = jax.random.split(key, 5)
    robot_obs = jax.random.normal(k1, (B, robot_dim), jnp.float32)
    object_obs = jax.random.normal(k2, (B, n_object, object_dim), jnp.float32)
    robot_goals = jax.random.normal(k3, (B, robot_dim), jnp.float32)
    object_goals = jax.random.normal(k4, (B, n_object, object_dim), jnp.float32)
    params = init_params(k5, 2 * (robot_dim + object_dim), hidden_size)

    out = deep_set_extractor_forward(robot_obs, object_obs, robot_goals, object_goals, params)
    out = jax.block_until_ready(out)

    ref = reference_forward(robot_obs, object_obs, robot_goals, object_goals, params)
    np.testing.assert_allclose(np.asarray(out), np.asarray(ref), rtol=2e-3, atol=2e-3)
    print("KERNEL_OK")
</pallas_src>

<mosaic_0001>
module attributes {stable_mosaic.version = 11 : i64} {
  func.func @kernel(%arg0: i32, %arg1: memref<4x14xf32, #tpu.memory_space<vmem>>, %arg2: memref<3x4x9xf32, #tpu.memory_space<vmem>>, %arg3: memref<3x4x9xf32, #tpu.memory_space<vmem>>, %arg4: memref<14x32xf32, #tpu.memory_space<vmem>>, %arg5: memref<9x32xf32, #tpu.memory_space<vmem>>, %arg6: memref<9x32xf32, #tpu.memory_space<vmem>>, %arg7: memref<32x32xf32, #tpu.memory_space<vmem>>, %arg8: memref<32x32xf32, #tpu.memory_space<vmem>>, %arg9: memref<3x32xf32, #tpu.memory_space<vmem>>, %arg10: memref<4x32xf32, #tpu.memory_space<vmem>>) attributes {dimension_semantics = [#tpu.dimension_semantics<parallel>], iteration_bounds = array<i64: 1>, scalar_prefetch = 0 : i64, scratch_operands = 0 : i64, tpu.core_type = #tpu.core_type<tc>, window_params = [{transform_indices = @transform_0, window_bounds = array<i64: 4, 14>}, {transform_indices = @transform_1, window_bounds = array<i64: 3, 4, 9>}, {transform_indices = @transform_2, window_bounds = array<i64: 3, 4, 9>}, {pipeline_mode = #tpu.pipeline_mode<synchronous>, transform_indices = @transform_3, window_bounds = array<i64: 14, 32>}, {pipeline_mode = #tpu.pipeline_mode<synchronous>, transform_indices = @transform_4, window_bounds = array<i64: 9, 32>}, {pipeline_mode = #tpu.pipeline_mode<synchronous>, transform_indices = @transform_5, window_bounds = array<i64: 9, 32>}, {pipeline_mode = #tpu.pipeline_mode<synchronous>, transform_indices = @transform_6, window_bounds = array<i64: 32, 32>}, {pipeline_mode = #tpu.pipeline_mode<synchronous>, transform_indices = @transform_7, window_bounds = array<i64: 32, 32>}, {pipeline_mode = #tpu.pipeline_mode<synchronous>, transform_indices = @transform_8, window_bounds = array<i64: 3, 32>}, {transform_indices = @transform_9, window_bounds = array<i64: 4, 32>}]} {
    %c0 = arith.constant 0 : index
    %c0_0 = arith.constant 0 : index
    %0 = vector.load %arg9[%c0, %c0_0] : memref<3x32xf32, #tpu.memory_space<vmem>>, vector<3x32xf32>
    %1 = vector.extract_strided_slice %0 {offsets = [0, 0], sizes = [1, 32], strides = [1, 1]} : vector<3x32xf32> to vector<1x32xf32>
    %2 = vector.extract_strided_slice %0 {offsets = [1, 0], sizes = [1, 32], strides = [1, 1]} : vector<3x32xf32> to vector<1x32xf32>
    %3 = vector.extract_strided_slice %0 {offsets = [2, 0], sizes = [1, 32], strides = [1, 1]} : vector<3x32xf32> to vector<1x32xf32>
    %c0_1 = arith.constant 0 : index
    %c0_2 = arith.constant 0 : index
    %4 = vector.load %arg5[%c0_1, %c0_2] : memref<9x32xf32, #tpu.memory_space<vmem>>, vector<9x32xf32>
    %c0_3 = arith.constant 0 : index
    %c0_4 = arith.constant 0 : index
    %5 = vector.load %arg6[%c0_3, %c0_4] : memref<9x32xf32, #tpu.memory_space<vmem>>, vector<9x32xf32>
    %c0_5 = arith.constant 0 : index
    %c0_6 = arith.constant 0 : index
    %6 = vector.load %arg7[%c0_5, %c0_6] : memref<32x32xf32, #tpu.memory_space<vmem>>, vector<32x32xf32>
    %c0_7 = arith.constant 0 : index
    %c0_8 = arith.constant 0 : index
    %7 = vector.load %arg8[%c0_7, %c0_8] : memref<32x32xf32, #tpu.memory_space<vmem>>, vector<32x32xf32>
    %c0_9 = arith.constant 0 : index
    %c0_10 = arith.constant 0 : index
    %8 = vector.load %arg1[%c0_9, %c0_10] : memref<4x14xf32, #tpu.memory_space<vmem>>, vector<4x14xf32>
    %c0_11 = arith.constant 0 : index
    %c0_12 = arith.constant 0 : index
    %9 = vector.load %arg4[%c0_11, %c0_12] : memref<14x32xf32, #tpu.memory_space<vmem>>, vector<14x32xf32>
    %cst = arith.constant dense<0.000000e+00> : vector<4x32xf32>
    %10 = tpu.matmul %8, %9, %cst {dimension_numbers = #tpu.dot_dimension_numbers<[1], [0], [0], [1], [0, 0, 1, 1], [], []>} : vector<4x14xf32>, vector<14x32xf32>, vector<4x32xf32> -> vector<4x32xf32>
    %11 = vector.broadcast %1 : vector<1x32xf32> to vector<4x32xf32>
    %12 = arith.addf %10, %11 : vector<4x32xf32>
    %cst_13 = arith.constant 0.000000e+00 : f32
    %13 = vector.broadcast %cst_13 : f32 to vector<4x32xf32>
    %c0_14 = arith.constant 0 : index
    %c0_15 = arith.constant 0 : index
    %c0_16 = arith.constant 0 : index
    %14 = vector.load %arg2[%c0_14, %c0_15, %c0_16] : memref<3x4x9xf32, #tpu.memory_space<vmem>>, vector<1x4x9xf32>
    %15 = vector.shape_cast %14 : vector<1x4x9xf32> to vector<4x9xf32>
    %cst_17 = arith.constant dense<0.000000e+00> : vector<4x32xf32>
    %16 = tpu.matmul %15, %4, %cst_17 {dimension_numbers = #tpu.dot_dimension_numbers<[1], [0], [0], [1], [0, 0, 1, 1], [], []>} : vector<4x9xf32>, vector<9x32xf32>, vector<4x32xf32> -> vector<4x32xf32>
    %17 = arith.addf %12, %16 : vector<4x32xf32>
    %c0_18 = arith.constant 0 : index
    %c0_19 = arith.constant 0 : index
    %c0_20 = arith.constant 0 : index
    %18 = vector.load %arg3[%c0_18, %c0_19, %c0_20] : memref<3x4x9xf32, #tpu.memory_space<vmem>>, vector<1x4x9xf32>
    %19 = vector.shape_cast %18 : vector<1x4x9xf32> to vector<4x9xf32>
    %cst_21 = arith.constant dense<0.000000e+00> : vector<4x32xf32>
    %20 = tpu.matmul %19, %5, %cst_21 {dimension_numbers = #tpu.dot_dimension_numbers<[1], [0], [0], [1], [0, 0, 1, 1], [], []>} : vector<4x9xf32>, vector<9x32xf32>, vector<4x32xf32> -> vector<4x32xf32>
    %21 = arith.addf %17, %20 : vector<4x32xf32>
    %cst_22 = arith.constant 0.000000e+00 : f32
    %22 = vector.broadcast %cst_22 : f32 to vector<4x32xf32>
    %23 = arith.maximumf %21, %22 : vector<4x32xf32>
    %cst_23 = arith.constant dense<0.000000e+00> : vector<4x32xf32>
    %24 = tpu.matmul %23, %6, %cst_23 {dimension_numbers = #tpu.dot_dimension_numbers<[1], [0], [0], [1], [0, 0, 1, 1], [], []>} : vector<4x32xf32>, vector<32x32xf32>, vector<4x32xf32> -> vector<4x32xf32>
    %25 = vector.broadcast %2 : vector<1x32xf32> to vector<4x32xf32>
    %26 = arith.addf %24, %25 : vector<4x32xf32>
    %cst_24 = arith.constant 0.000000e+00 : f32
    %27 = vector.broadcast %cst_24 : f32 to vector<4x32xf32>
    %28 = arith.maximumf %26, %27 : vector<4x32xf32>
    %cst_25 = arith.constant dense<0.000000e+00> : vector<4x32xf32>
    %29 = tpu.matmul %28, %7, %cst_25 {dimension_numbers = #tpu.dot_dimension_numbers<[1], [0], [0], [1], [0, 0, 1, 1], [], []>} : vector<4x32xf32>, vector<32x32xf32>, vector<4x32xf32> -> vector<4x32xf32>
    %30 = vector.broadcast %3 : vector<1x32xf32> to vector<4x32xf32>
    %31 = arith.addf %29, %30 : vector<4x32xf32>
    %cst_26 = arith.constant 0.000000e+00 : f32
    %32 = vector.broadcast %cst_26 : f32 to vector<4x32xf32>
    %33 = arith.maximumf %31, %32 : vector<4x32xf32>
    %34 = arith.addf %13, %33 : vector<4x32xf32>
    %c1 = arith.constant 1 : index
    %c0_27 = arith.constant 0 : index
    %c0_28 = arith.constant 0 : index
    %35 = vector.load %arg2[%c1, %c0_27, %c0_28] : memref<3x4x9xf32, #tpu.memory_space<vmem>>, vector<1x4x9xf32>
    %36 = vector.shape_cast %35 : vector<1x4x9xf32> to vector<4x9xf32>
    %cst_29 = arith.constant dense<0.000000e+00> : vector<4x32xf32>
    %37 = tpu.matmul %36, %4, %cst_29 {dimension_numbers = #tpu.dot_dimension_numbers<[1], [0], [0], [1], [0, 0, 1, 1], [], []>} : vector<4x9xf32>, vector<9x32xf32>, vector<4x32xf32> -> vector<4x32xf32>
    %38 = arith.addf %12, %37 : vector<4x32xf32>
    %c1_30 = arith.constant 1 : index
    %c0_31 = arith.constant 0 : index
    %c0_32 = arith.constant 0 : index
    %39 = vector.load %arg3[%c1_30, %c0_31, %c0_32] : memref<3x4x9xf32, #tpu.memory_space<vmem>>, vector<1x4x9xf32>
    %40 = vector.shape_cast %39 : vector<1x4x9xf32> to vector<4x9xf32>
    %cst_33 = arith.constant dense<0.000000e+00> : vector<4x32xf32>
    %41 = tpu.matmul %40, %5, %cst_33 {dimension_numbers = #tpu.dot_dimension_numbers<[1], [0], [0], [1], [0, 0, 1, 1], [], []>} : vector<4x9xf32>, vector<9x32xf32>, vector<4x32xf32> -> vector<4x32xf32>
    %42 = arith.addf %38, %41 : vector<4x32xf32>
    %cst_34 = arith.constant 0.000000e+00 : f32
    %43 = vector.broadcast %cst_34 : f32 to vector<4x32xf32>
    %44 = arith.maximumf %42, %43 : vector<4x32xf32>
    %cst_35 = arith.constant dense<0.000000e+00> : vector<4x32xf32>
    %45 = tpu.matmul %44, %6, %cst_35 {dimension_numbers = #tpu.dot_dimension_numbers<[1], [0], [0], [1], [0, 0, 1, 1], [], []>} : vector<4x32xf32>, vector<32x32xf32>, vector<4x32xf32> -> vector<4x32xf32>
    %46 = vector.broadcast %2 : vector<1x32xf32> to vector<4x32xf32>
    %47 = arith.addf %45, %46 : vector<4x32xf32>
    %cst_36 = arith.constant 0.000000e+00 : f32
    %48 = vector.broadcast %cst_36 : f32 to vector<4x32xf32>
    %49 = arith.maximumf %47, %48 : vector<4x32xf32>
    %cst_37 = arith.constant dense<0.000000e+00> : vector<4x32xf32>
    %50 = tpu.matmul %49, %7, %cst_37 {dimension_numbers = #tpu.dot_dimension_numbers<[1], [0], [0], [1], [0, 0, 1, 1], [], []>} : vector<4x32xf32>, vector<32x32xf32>, vector<4x32xf32> -> vector<4x32xf32>
    %51 = vector.broadcast %3 : vector<1x32xf32> to vector<4x32xf32>
    %52 = arith.addf %50, %51 : vector<4x32xf32>
    %cst_38 = arith.constant 0.000000e+00 : f32
    %53 = vector.broadcast %cst_38 : f32 to vector<4x32xf32>
    %54 = arith.maximumf %52, %53 : vector<4x32xf32>
    %55 = arith.addf %34, %54 : vector<4x32xf32>
    %c2 = arith.constant 2 : index
    %c0_39 = arith.constant 0 : index
    %c0_40 = arith.constant 0 : index
    %56 = vector.load %arg2[%c2, %c0_39, %c0_40] : memref<3x4x9xf32, #tpu.memory_space<vmem>>, vector<1x4x9xf32>
    %57 = vector.shape_cast %56 : vector<1x4x9xf32> to vector<4x9xf32>
    %cst_41 = arith.constant dense<0.000000e+00> : vector<4x32xf32>
    %58 = tpu.matmul %57, %4, %cst_41 {dimension_numbers = #tpu.dot_dimension_numbers<[1], [0], [0], [1], [0, 0, 1, 1], [], []>} : vector<4x9xf32>, vector<9x32xf32>, vector<4x32xf32> -> vector<4x32xf32>
    %59 = arith.addf %12, %58 : vector<4x32xf32>
    %c2_42 = arith.constant 2 : index
    %c0_43 = arith.constant 0 : index
    %c0_44 = arith.constant 0 : index
    %60 = vector.load %arg3[%c2_42, %c0_43, %c0_44] : memref<3x4x9xf32, #tpu.memory_space<vmem>>, vector<1x4x9xf32>
    %61 = vector.shape_cast %60 : vector<1x4x9xf32> to vector<4x9xf32>
    %cst_45 = arith.constant dense<0.000000e+00> : vector<4x32xf32>
    %62 = tpu.matmul %61, %5, %cst_45 {dimension_numbers = #tpu.dot_dimension_numbers<[1], [0], [0], [1], [0, 0, 1, 1], [], []>} : vector<4x9xf32>, vector<9x32xf32>, vector<4x32xf32> -> vector<4x32xf32>
    %63 = arith.addf %59, %62 : vector<4x32xf32>
    %cst_46 = arith.constant 0.000000e+00 : f32
    %64 = vector.broadcast %cst_46 : f32 to vector<4x32xf32>
    %65 = arith.maximumf %63, %64 : vector<4x32xf32>
    %cst_47 = arith.constant dense<0.000000e+00> : vector<4x32xf32>
    %66 = tpu.matmul %65, %6, %cst_47 {dimension_numbers = #tpu.dot_dimension_numbers<[1], [0], [0], [1], [0, 0, 1, 1], [], []>} : vector<4x32xf32>, vector<32x32xf32>, vector<4x32xf32> -> vector<4x32xf32>
    %67 = vector.broadcast %2 : vector<1x32xf32> to vector<4x32xf32>
    %68 = arith.addf %66, %67 : vector<4x32xf32>
    %cst_48 = arith.constant 0.000000e+00 : f32
    %69 = vector.broadcast %cst_48 : f32 to vector<4x32xf32>
    %70 = arith.maximumf %68, %69 : vector<4x32xf32>
    %cst_49 = arith.constant dense<0.000000e+00> : vector<4x32xf32>
    %71 = tpu.matmul %70, %7, %cst_49 {dimension_numbers = #tpu.dot_dimension_numbers<[1], [0], [0], [1], [0, 0, 1, 1], [], []>} : vector<4x32xf32>, vector<32x32xf32>, vector<4x32xf32> -> vector<4x32xf32>
    %72 = vector.broadcast %3 : vector<1x32xf32> to vector<4x32xf32>
    %73 = arith.addf %71, %72 : vector<4x32xf32>
    %cst_50 = arith.constant 0.000000e+00 : f32
    %74 = vector.broadcast %cst_50 : f32 to vector<4x32xf32>
    %75 = arith.maximumf %73, %74 : vector<4x32xf32>
    %76 = arith.addf %55, %75 : vector<4x32xf32>
    %cst_51 = arith.constant 0.333333343 : f32
    %77 = vector.broadcast %cst_51 : f32 to vector<4x32xf32>
    %78 = arith.mulf %76, %77 : vector<4x32xf32>
    %c0_52 = arith.constant 0 : index
    %c0_53 = arith.constant 0 : index
    %79 = vector.load %arg10[%c0_52, %c0_53] : memref<4x32xf32, #tpu.memory_space<vmem>>, vector<4x32xf32>
    tpu.vector_store %arg10[%c0_52, %c0_53], %78 {strides = array<i32>} : memref<4x32xf32, #tpu.memory_space<vmem>>, vector<4x32xf32>,
    return
  }
  func.func @transform_0(%arg0: i32) -> (i32, i32) {
    %c0_i32 = arith.constant 0 : i32
    %c0_i32_0 = arith.constant 0 : i32
    return %arg0, %c0_i32 : i32, i32
  }
  func.func @transform_1(%arg0: i32) -> (i32, i32, i32) {
    %c0_i32 = arith.constant 0 : i32
    %c0_i32_0 = arith.constant 0 : i32
    %c0_i32_1 = arith.constant 0 : i32
    return %c0_i32, %arg0, %c0_i32_0 : i32, i32, i32
  }
  func.func @transform_2(%arg0: i32) -> (i32, i32, i32) {
    %c0_i32 = arith.constant 0 : i32
    %c0_i32_0 = arith.constant 0 : i32
    %c0_i32_1 = arith.constant 0 : i32
    return %c0_i32, %arg0, %c0_i32_0 : i32, i32, i32
  }
  func.func @transform_3(%arg0: i32) -> (i32, i32) {
    %c0_i32 = arith.constant 0 : i32
    %c0_i32_0 = arith.constant 0 : i32
    %c0_i32_1 = arith.constant 0 : i32
    return %c0_i32, %c0_i32_0 : i32, i32
  }
  func.func @transform_4(%arg0: i32) -> (i32, i32) {
    %c0_i32 = arith.constant 0 : i32
    %c0_i32_0 = arith.constant 0 : i32
    %c0_i32_1 = arith.constant 0 : i32
    return %c0_i32, %c0_i32_0 : i32, i32
  }
  func.func @transform_5(%arg0: i32) -> (i32, i32) {
    %c0_i32 = arith.constant 0 : i32
    %c0_i32_0 = arith.constant 0 : i32
    %c0_i32_1 = arith.constant 0 : i32
    return %c0_i32, %c0_i32_0 : i32, i32
  }
  func.func @transform_6(%arg0: i32) -> (i32, i32) {
    %c0_i32 = arith.constant 0 : i32
    %c0_i32_0 = arith.constant 0 : i32
    %c0_i32_1 = arith.constant 0 : i32
    return %c0_i32, %c0_i32_0 : i32, i32
  }
  func.func @transform_7(%arg0: i32) -> (i32, i32) {
    %c0_i32 = arith.constant 0 : i32
    %c0_i32_0 = arith.constant 0 : i32
    %c0_i32_1 = arith.constant 0 : i32
    return %c0_i32, %c0_i32_0 : i32, i32
  }
  func.func @transform_8(%arg0: i32) -> (i32, i32) {
    %c0_i32 = arith.constant 0 : i32
    %c0_i32_0 = arith.constant 0 : i32
    %c0_i32_1 = arith.constant 0 : i32
    return %c0_i32, %c0_i32_0 : i32, i32
  }
  func.func @transform_9(%arg0: i32) -> (i32, i32) {
    %c0_i32 = arith.constant 0 : i32
    %c0_i32_0 = arith.constant 0 : i32
    return %arg0, %c0_i32 : i32, i32
  }
}

</mosaic_0001>

<bundles_post_ra>
// kernel: tpu_custom_call.1
= control target key start
LH: loop header
LB: loop body
LE: loop exit
PB: predicated region body
PF: predicated region fallthrough
CT: control target
= control target key end

     0   :  { %14 = vsyncpa [#allocation3], 0  ;;  %s1936_s0 = inlined_call_operand.hbm [shape: f32[4,14], index: 0, kind: input, shape index: {}]   ;;  %s1937_s1 = inlined_call_operand.hbm [shape: f32[3,4,9], index: 1, kind: input, shape index: {}]   ;;  %s1938_s2 = inlined_call_operand.hbm [shape: f32[3,4,9], index: 2, kind: input, shape index: {}]   ;;  %s1939_s3 = inlined_call_operand.hbm [shape: f32[14,32], index: 3, kind: input, shape index: {}]   ;;  %s1940_s4 = inlined_call_operand.hbm [shape: f32[9,32], index: 4, kind: input, shape index: {}]   ;;  %s1941_s5 = inlined_call_operand.vmem [shape: f32[9,32], index: 5, kind: input, shape index: {}]   ;;  %s1942_s6 = inlined_call_operand.hbm [shape: f32[32,32], index: 6, kind: input, shape index: {}]   ;;  %s1943_s7 = inlined_call_operand.hbm [shape: f32[32,32], index: 7, kind: input, shape index: {}]   ;;  %s1944_s8 = inlined_call_operand.vmem [shape: f32[3,32], index: 8, kind: input, shape index: {}]   ;;  %s1945_s9 = inlined_call_operand.hbm [shape: f32[4,32], index: 9, kind: output, shape index: {}]  }
   0x1   :  { %15 = vsyncpa [#allocation6], 0 }
   0x2   :  { %16 = vsyncpa [#allocation9], 0 }
   0x3   :  { %17 = vsyncpa [#allocation12], 0 }
   0x4   :  { %18 = vsyncpa [#allocation4], 0  ;;  %s1627_s30 = smov [#allocation5]   ;;  %s1441_s13 = scalar_lea.hbm %s1937_s1, 192 }
   0x5   :  { %s34_s10 = sshll.u32 %s1627_s30, 4  ;;  %p1442_p0 = scmp.ne.s32.totalorder %s1937_s1, %s1441_s13  ;;  %s35_s10 = int_to_ptr.vmem [resolvable:$true] %s34_s10 }
   0x6   :  { %p1445_p1 = scmp.lt.u32.totalorder %s1441_s13, %s1937_s1 }
   0x8   :  { %p1447_p2 = pnand %p1445_p1, %p1442_p0 }
   0xa   :  { %1450 = shalt.err (!%p1447_p2)
}
   0xb   :  { %s1451_s18 = scalar_lea.vmem %s35_s10, 192  ;;  %p1456_p4 = scmp.lt.s32.totalorder %s35_s10, %s35_s10 }
   0xc   :  { %p1452_p3 = scmp.ne.s32.totalorder %s35_s10, %s1451_s18  ;;  %p1457_p5 = scmp.lt.s32.totalorder %s1451_s18, %s1451_s18 }
   0xe   :  { %p1458_p6 = por %p1457_p5, %p1456_p4 }
  0x10   :  { %p1459_p7 = pnand %p1458_p6, %p1452_p3 }
  0x12   :  { %1462 = shalt.err (!%p1459_p7)
}
  0x13   :  { %s1628_s19 = smov 64   ;;  %s1629_s20 = smov 4  }
  0x14   :  { %40 = dma.hbm_to_vmem [thread:$0]  %s1937_s1, 192, %s35_s10, [#allocation6], %s1628_s19, %s1628_s19, %s1629_s20  }
  0x15   :  { %s1630_s23 = smov [#allocation8]   ;;  %s1463_s27 = scalar_lea.hbm %s1939_s3, 256 }
  0x16   :  { %s58_s24 = sshll.u32 %s1630_s23, 4  ;;  %p1464_p8 = scmp.ne.s32.totalorder %s1939_s3, %s1463_s27  ;;  %s59_s24 = int_to_ptr.vmem [resolvable:$true] %s58_s24 }
  0x17   :  { %p1467_p9 = scmp.lt.u32.totalorder %s1463_s27, %s1939_s3 }
  0x19   :  { %p1469_p10 = pnand %p1467_p9, %p1464_p8 }
  0x1b   :  { %1472 = shalt.err (!%p1469_p10)
}
  0x1c   :  { %s1473_s12 = scalar_lea.vmem %s59_s24, 256  ;;  %p1478_p12 = scmp.lt.s32.totalorder %s59_s24, %s59_s24 }
  0x1d   :  { %p1474_p11 = scmp.ne.s32.totalorder %s59_s24, %s1473_s12  ;;  %p1479_p13 = scmp.lt.s32.totalorder %s1473_s12, %s1473_s12 }
  0x1f   :  { %p1480_p0 = por %p1479_p13, %p1478_p12 }
  0x21   :  { %p1481_p1 = pnand %p1480_p0, %p1474_p11 }
  0x23   :  { %1484 = shalt.err (!%p1481_p1)
}
  0x24   :  { %s1631_s1 = smov 128   ;;  %s1632_s10 = smov 8  }
  0x25   :  { %64 = dma.hbm_to_vmem [thread:$0]  %s1939_s3, 256, %s59_s24, [#allocation9], %s1631_s1, %s1631_s1, %s1632_s10  }
  0x26   :  { %s1633_s15 = smov [#allocation11]   ;;  %s1634_s17 = smov [#allocation2]  }
  0x27   :  { %s84_s16 = sshll.u32 %s1633_s15, 4  ;;  %s25_s18 = sshll.u32 %s1634_s17, 4  ;;  %s85_s16 = int_to_ptr.vmem [resolvable:$true] %s84_s16  ;;  %s26_s18 = int_to_ptr.vmem [resolvable:$true] %s25_s18 }
  0x28   :  { %s1485_s23 = scalar_lea.hbm %s1942_s6, 512 }
  0x29   :  { %p1486_p2 = scmp.ne.s32.totalorder %s1942_s6, %s1485_s23  ;;  %p1489_p3 = scmp.lt.u32.totalorder %s1485_s23, %s1942_s6 }
  0x2b   :  { %p1491_p4 = pnand %p1489_p3, %p1486_p2 }
  0x2d   :  { %1494 = shalt.err (!%p1491_p4)
}
  0x2e   :  { %s1495_s3 = scalar_lea.vmem %s85_s16, 512  ;;  %p1500_p6 = scmp.lt.s32.totalorder %s85_s16, %s85_s16 }
  0x2f   :  { %p1496_p5 = scmp.ne.s32.totalorder %s85_s16, %s1495_s3  ;;  %p1501_p7 = scmp.lt.s32.totalorder %s1495_s3, %s1495_s3 }
  0x31   :  { %p1502_p8 = por %p1501_p7, %p1500_p6 }
  0x33   :  { %p1503_p9 = pnand %p1502_p8, %p1496_p5 }
  0x35   :  { %1506 = shalt.err (!%p1503_p9)
}
  0x36   :  { %90 = dma.hbm_to_vmem [thread:$0]  %s1942_s6, 512, %s85_s16, [#allocation12], %s1631_s1, %s1631_s1, %s1632_s10  }
  0x37   :  { %s1507_s12 = scalar_lea.hbm %s1936_s0, 64 }
  0x38   :  { %p1508_p10 = scmp.ne.s32.totalorder %s1936_s0, %s1507_s12  ;;  %p1511_p11 = scmp.lt.u32.totalorder %s1507_s12, %s1936_s0 }
  0x3a   :  { %p1513_p12 = pnand %p1511_p11, %p1508_p10 }
  0x3c   :  { %1516 = shalt.err (!%p1513_p12)
}
  0x3d   :  { %s1517_s21 = scalar_lea.vmem %s26_s18, 64  ;;  %p1522_p0 = scmp.lt.s32.totalorder %s26_s18, %s26_s18 }
  0x3e   :  { %p1518_p13 = scmp.ne.s32.totalorder %s26_s18, %s1517_s21  ;;  %p1523_p1 = scmp.lt.s32.totalorder %s1517_s21, %s1517_s21 }
  0x40   :  { %p1524_p2 = por %p1523_p1, %p1522_p0 }
  0x42   :  { %p1525_p3 = pnand %p1524_p2, %p1518_p13 }
  0x44   :  { %1528 = shalt.err (!%p1525_p3)
}
  0x45   :  { %28 = dma.hbm_to_vmem [thread:$0]  %s1936_s0, 64, %s26_s18, [#allocation3]  }
  0x46   :  { %s1635_s22 = smov [#allocation7]   ;;  %s1636_s25 = smov [#allocation10]  }
  0x47   :  { %s46_s23 = sshll.u32 %s1635_s22, 4  ;;  %s70_s26 = sshll.u32 %s1636_s25, 4  ;;  %s47_s23 = int_to_ptr.vmem [resolvable:$true] %s46_s23  ;;  %s1750_s26 = int_to_ptr.vmem [resolvable:$true] %s70_s26 }
  0x48   :  { %s1529_s3 = scalar_lea.hbm %s1938_s2, 192 }
  0x49   :  { %p1530_p4 = scmp.ne.s32.totalorder %s1938_s2, %s1529_s3  ;;  %p1533_p5 = scmp.lt.u32.totalorder %s1529_s3, %s1938_s2 }
  0x4b   :  { %p1535_p6 = pnand %p1533_p5, %p1530_p4 }
  0x4d   :  { %1538 = shalt.err (!%p1535_p6)
}
  0x4e   :  { %s1539_s0 = scalar_lea.vmem %s47_s23, 192  ;;  %p1544_p8 = scmp.lt.s32.totalorder %s47_s23, %s47_s23 }
  0x4f   :  { %p1540_p7 = scmp.ne.s32.totalorder %s47_s23, %s1539_s0  ;;  %p1545_p9 = scmp.lt.s32.totalorder %s1539_s0, %s1539_s0 }
  0x51   :  { %p1546_p10 = por %p1545_p9, %p1544_p8 }
  0x53   :  { %p1547_p11 = pnand %p1546_p10, %p1540_p7 }
  0x55   :  { %1550 = shalt.err (!%p1547_p11)
}
  0x56   :  { %52 = dma.hbm_to_vmem [thread:$0]  %s1938_s2, 192, %s47_s23, [#allocation6], %s1628_s19, %s1628_s19, %s1629_s20  }
  0x57   :  { %s1551_s15 = scalar_lea.hbm %s1940_s4, 256 }
  0x58   :  { %p1552_p12 = scmp.ne.s32.totalorder %s1940_s4, %s1551_s15  ;;  %p1555_p13 = scmp.lt.u32.totalorder %s1551_s15, %s1940_s4 }
  0x5a   :  { %p1557_p0 = pnand %p1555_p13, %p1552_p12 }
  0x5c   :  { %1560 = shalt.err (!%p1557_p0)
}
  0x5d   :  { %s1561_s22 = scalar_lea.vmem %s1750_s26, 256  ;;  %p1566_p2 = scmp.lt.s32.totalorder %s1750_s26, %s1750_s26 }
  0x5e   :  { %p1562_p1 = scmp.ne.s32.totalorder %s1750_s26, %s1561_s22  ;;  %p1567_p3 = scmp.lt.s32.totalorder %s1561_s22, %s1561_s22 }
  0x60   :  { %p1568_p4 = por %p1567_p3, %p1566_p2 }
  0x62   :  { %p1569_p5 = pnand %p1568_p4, %p1562_p1 }
  0x64   :  { %1572 = shalt.err (!%p1569_p5)
}
  0x65   :  { %76 = dma.hbm_to_vmem [thread:$0]  %s1940_s4, 256, %s1750_s26, [#allocation9], %s1631_s1, %s1631_s1, %s1632_s10  }
  0x66   :  { %s1637_s20 = smov [#allocation13]   ;;  %s1573_s28 = scalar_lea.hbm %s1943_s7, 512 }
  0x67   :  { %s96_s23 = sshll.u32 %s1637_s20, 4  ;;  %p1574_p6 = scmp.ne.s32.totalorder %s1943_s7, %s1573_s28  ;;  %s97_s23 = int_to_ptr.vmem [resolvable:$true] %s96_s23 }
  0x68   :  { %p1577_p7 = scmp.lt.u32.totalorder %s1573_s28, %s1943_s7 }
  0x6a   :  { %p1579_p8 = pnand %p1577_p7, %p1574_p6 }
  0x6c   :  { %1582 = shalt.err (!%p1579_p8)
}
  0x6d   :  { %s1583_s11 = scalar_lea.vmem %s97_s23, 512  ;;  %p1588_p10 = scmp.lt.s32.totalorder %s97_s23, %s97_s23 }
  0x6e   :  { %p1584_p9 = scmp.ne.s32.totalorder %s97_s23, %s1583_s11  ;;  %p1589_p11 = scmp.lt.s32.totalorder %s1583_s11, %s1583_s11 }
  0x70   :  { %p1590_p12 = por %p1589_p11, %p1588_p10 }
  0x72   :  { %p1591_p13 = pnand %p1590_p12, %p1584_p9 }
  0x74   :  { %1594 = shalt.err (!%p1591_p13)
}
  0x75   :  { %102 = dma.hbm_to_vmem [thread:$0]  %s1943_s7, 512, %s97_s23, [#allocation12], %s1631_s1, %s1631_s1, %s1632_s10  }
  0x76   :  { %1617 = dma.done.wait [#allocation3], 64  }
  0x77   :  { %1618 = vsyncadd [#allocation3], 4294967232 }
  0x78   :  { %1619 = dma.done.wait [#allocation6], 384  }
  0x79   :  { %1620 = vsyncadd [#allocation6], 4294966912 }
  0x7a   :  { %1621 = dma.done.wait [#allocation9], 512  }
  0x7b   :  { %1622 = vsyncadd [#allocation9], 4294966784 }
  0x7c   :  { %1623 = dma.done.wait [#allocation12], 1024  }
  0x7d   :  { %1624 = vsyncadd [#allocation12], 4294966272  ;;  %v1638_v0 = vmov 0.0|0.0   ;;  %vm1639_vm0 = vmmov 0   ;;  %v1640_v1 = vmov 0.0   ;;  %vm229_vm1 = vcmask 1040384  }
  0x7e   :  { %1356 = vmatprep.subr.bf16.mxu1 %v1638_v0  ;;  %1352 = vmatprep.subr.bf16.mxu0 %v1638_v0  ;;  %vm150_vm2 = vcmask 1045504   ;;  %v127_v2 = vld [vmem:[#allocation10] sm:$0xff]  ;;  %v128_v3 = vld [vmem:[#allocation10 + $0x8] sm:$0x1]  ;;  %vm1641_vm3 = vmmov 1   ;;  %v140_v8 = vld [vmem:[#allocation8] sm:$0xff]  ;;  %v142_v24 = vlaneseq }
  0x7f   :  { %1248 = vmatprep.mubr.msk.f32.mxu1 %vm1639_vm0, %v1640_v1  ;;  %1241 = vmatprep.mubr.msk.f32.mxu0 %vm1639_vm0, %v1640_v1  ;;  %vm1808_vm4 = vmpackc.low %vm229_vm1, %vm1641_vm3  ;;  %v1812_v5 = vpack.c.bf16 %v128_v3, %v127_v2  ;;  %v129_v6 = vld [vmem:[%s1941_s5] sm:$0xff]  ;;  %v130_v7 = vld [vmem:[%s1941_s5 + $0x8] sm:$0x1]  ;;  %vm225_vm6 = vcmask 72704   ;;  %vm146_vm7 = vcmask 113664   ;;  %vm387_vm8 = vcmask 261120  }
  0x80   :  { %v141_v9 = vld [vmem:[#allocation8 + $0x8] sm:$0x3f]  ;;  %vm1354_vm5 = vmpackc.low %vm150_vm2, %vm1641_vm3  ;;  %v1823_v11 = vpack.c.bf16 %v130_v7, %v129_v6  ;;  %v139_v13 = vld [vmem:[#allocation2] sm:$0xf]  ;;  %v1851_v25 = vshrl.u32 %v142_v24, 7  ;;  %vm1146_vm9 = vcmask 257024  }
  0x81   :  { %1359 = vmatpush3.bf16.msk.msra.mxu1 %vm1808_vm4, %v1812_v5  ;;  %v224_v10 = vld [vmem:[#allocation5] sm:$0xf]  ;;  %v1353_v12 = vpack.c.bf16 %v141_v9, %v140_v8  ;;  %v304_v14 = vld [vmem:[#allocation7] sm:$0xf]  ;;  %v131_v15 = vld [vmem:[#allocation11] sm:$0xff] }
  0x82   :  { %1360 = vmatprep.subr.bf16.mxu1 %v1638_v0  ;;  %v132_v16 = vld [vmem:[#allocation11 + $0x8] sm:$0xff]  ;;  %v133_v18 = vld [vmem:[#allocation11 + $0x10] sm:$0xff]  ;;  %v134_v19 = vld [vmem:[#allocation11 + $0x18] sm:$0xff]  ;;  %v144_v26 = vsub.s32 0, %v1851_v25  ;;  %v385_v41 = vsub.s32 1, %v1851_v25  ;;  %v464_v63 = vsub.s32 2, %v1851_v25 }
  0x83   :  { %1355 = vmatpush3.bf16.msk.msra.mxu0 %vm1354_vm5, %v1353_v12  ;;  %v1839_v17 = vpack.c.bf16 %v132_v16, %v131_v15  ;;  %v1843_v20 = vpack.c.bf16 %v134_v19, %v133_v18  ;;  %v135_v21 = vld [vmem:[#allocation13] sm:$0xff]  ;;  %v136_v22 = vld [vmem:[#allocation13 + $0x8] sm:$0xff]  ;;  %v1857_v27 = vld [vmem:[%s1944_s8] sm:$0x7]  ;;  %s1642_s8 = smov [#allocation14]  }
  0x84   :  { %1249 = vmatmul.mubr.msk.f32.vlgmr.msra.gmra.mrb[0].mxu1 %vm225_vm6, %v224_v10  ;;  %1364 = vmatprep.subr.bf16.mxu0 %v1638_v0  ;;  %v1847_v23 = vpack.c.bf16 %v136_v22, %v135_v21  ;;  %v145_v28 = vrot.slane %v1857_v27, %v144_v26  ;;  %v542_v36 = vld [vmem:[#allocation5 + $0x4] sm:$0xf]  ;;  %v618_v37 = vld [vmem:[#allocation7 + $0x4] sm:$0xf]  ;;  %v137_v38 = vld [vmem:[#allocation13 + $0x10] sm:$0xff]  ;;  %v386_v42 = vrot.slane %v1857_v27, %v385_v41  ;;  %s1154_s12 = sshll.u32 %s1642_s8, 4  ;;  %s1155_s12 = int_to_ptr.vmem [resolvable:$true] %s1154_s12 }
  0x85   :  { %1363 = vmatpush3.bf16.msk.msra.mxu1 %vm1808_vm4, %v1823_v11  ;;  %1255 = vmatprep.mubr.msk.f32.mxu1 %vm1639_vm0, %v1640_v1  ;;  %v138_v39 = vld [vmem:[#allocation13 + $0x18] sm:$0xff]  ;;  %v844_v51 = vld [vmem:[#allocation5 + $0x8] sm:$0xf]  ;;  %v465_v2 = vrot.slane %v1857_v27, %v464_v63  ;;  %s1595_s13 = scalar_lea.vmem %s1155_s12, 64  ;;  %p1600_p1 = scmp.lt.s32.totalorder %s1155_s12, %s1155_s12 }
  0x86   :  { %1242 = vmatmul.mubr.msk.f32.vlgmr.msra.gmra.mrb[0].mxu0 %vm146_vm7, %v139_v13  ;;  %1370 = vmatprep.subr.bf16.mxu1 %v1638_v0  ;;  %v1374_v40 = vpack.c.bf16 %v138_v39, %v137_v38  ;;  %v920_v52 = vld [vmem:[#allocation7 + $0x8] sm:$0xf]  ;;  %p1596_p0 = scmp.ne.s32.totalorder %s1155_s12, %s1595_s13  ;;  %p1601_p2 = scmp.lt.s32.totalorder %s1595_s13, %s1595_s13 }
  0x87   :  { %1266 = vmatprep.mubr.msk.f32.mxu0 %vm1639_vm0, %v1640_v1  ;;  %1366 = vmatpush3.bf16.msra.mxu0 %v1839_v17 }
  0x88   :  { %1367 = vmatprep.subr.bf16.mxu0 %v1638_v0  ;;  %p1602_p3 = por %p1601_p2, %p1600_p1 }
  0x8a   :  { %p1603_p4 = pnand %p1602_p3, %p1596_p0 }
  0x8b   :  { %1369 = vmatpush3.bf16.msra.mxu0 %v1843_v20 }
  0x8c   :  { %1256 = vmatmul.mubr.msk.f32.vlgmr.msra.gmra.mrb[0].mxu1 %vm225_vm6, %v304_v14  ;;  %1376 = vmatprep.subr.bf16.mxu0 %v1638_v0 }
  0x8d   :  { %1277 = vmatprep.mubr.msk.f32.mxu1 %vm1639_vm0, %v1640_v1  ;;  %1372 = vmatpush3.bf16.msra.mxu1 %v1847_v23 }
  0x8e   :  { %1373 = vmatprep.subr.bf16.mxu1 %v1638_v0 }
  0x91   :  { %1375 = vmatpush3.bf16.msra.mxu1 %v1374_v40 }
  0x92   :  { %1384 = vmatprep.subr.bf16.mxu1 %v1638_v0 }
 0x159   :  { %v220_v29 = vpop.f32.mrb[0].mxu0 }
 0x15a   :  { %v1243_v30 = vpop.f32.mrb[1].mxu0  ;;  %v1860_v31 = vadd.f32 %v220_v29, %v145_v28 }
 0x15f   :  { %v377_v32 = vpop.f32.mrb[0].mxu1 }
 0x160   :  { %v1416_v33 = vadd.f32 %v377_v32, %v1860_v31  ;;  %v1257_v34 = vpop.f32.mrb[1].mxu1 }
 0x162   :  { %v382_v35 = vmax.f32 %v1416_v33, 0.0 }
 0x164   :  { %1267 = vmatmul.mubr.msk.f32.vlgmr.msra.gmra.mrb[2].mxu0 %vm387_vm8, %v382_v35 }
 0x165   :  { %1379 = vmatpush3.bf16.msk.msra.mxu0 %vm1808_vm4, %v1812_v5  ;;  %1284 = vmatprep.mubr.msk.f32.mxu0 %vm1639_vm0, %v1640_v1 }
 0x166   :  { %1380 = vmatprep.subr.bf16.mxu0 %v1638_v0 }
 0x168   :  { %1285 = vmatmul.mubr.msk.f32.vlgmr.msra.gmra.mrb[4].mxu0 %vm225_vm6, %v542_v36 }
 0x169   :  { %1383 = vmatpush3.bf16.msk.msra.mxu0 %vm1808_vm4, %v1823_v11  ;;  %1291 = vmatprep.mubr.msk.f32.mxu0 %vm1639_vm0, %v1640_v1 }
 0x16a   :  { %1390 = vmatprep.subr.bf16.mxu0 %v1638_v0 }
 0x170   :  { %1292 = vmatmul.mubr.msk.f32.vlgmr.msra.gmra.mrb[4].mxu0 %vm225_vm6, %v618_v37 }
 0x171   :  { %1392 = vmatpush3.bf16.msra.mxu0 %v1847_v23  ;;  %1313 = vmatprep.mubr.msk.f32.mxu0 %vm1639_vm0, %v1640_v1 }
 0x172   :  { %1393 = vmatprep.subr.bf16.mxu0 %v1638_v0 }
 0x175   :  { %1395 = vmatpush3.bf16.msra.mxu0 %v1374_v40 }
 0x176   :  { %1404 = vmatprep.subr.bf16.mxu0 %v1638_v0 }
 0x237   :  { %v457_v43 = vpop.f32.mrb[2].mxu0 }
 0x238   :  { %v458_v44 = vadd.f32 %v457_v43, %v386_v42  ;;  %v1268_v45 = vpop.f32.mrb[3].mxu0 }
 0x23a   :  { %v461_v46 = vmax.f32 %v458_v44, 0.0 }
 0x23c   :  { %1278 = vmatmul.mubr.msk.f32.vlgmr.msra.gmra.mrb[2].mxu1 %vm387_vm8, %v461_v46 }
 0x23d   :  { %1386 = vmatpush3.bf16.msra.mxu1 %v1839_v17  ;;  %1302 = vmatprep.mubr.msk.f32.mxu1 %vm1639_vm0, %v1640_v1 }
 0x23e   :  { %1387 = vmatprep.subr.bf16.mxu1 %v1638_v0 }
 0x241   :  { %1389 = vmatpush3.bf16.msra.mxu1 %v1843_v20 }
 0x242   :  { %1396 = vmatprep.subr.bf16.mxu1 %v1638_v0 }
 0x243   :  { %v688_v47 = vpop.f32.mrb[4].mxu0 }
 0x244   :  { %v1417_v48 = vadd.f32 %v688_v47, %v1860_v31  ;;  %v1293_v49 = vpop.f32.mrb[5].mxu0 }
 0x246   :  { %v693_v50 = vmax.f32 %v1417_v48, 0.0 }
 0x248   :  { %1303 = vmatmul.mubr.msk.f32.vlgmr.msra.gmra.mrb[4].mxu1 %vm387_vm8, %v693_v50 }
 0x249   :  { %1399 = vmatpush3.bf16.msk.msra.mxu1 %vm1808_vm4, %v1812_v5  ;;  %1320 = vmatprep.mubr.msk.f32.mxu1 %vm1639_vm0, %v1640_v1 }
 0x24a   :  { %1400 = vmatprep.subr.bf16.mxu1 %v1638_v0 }
 0x24c   :  { %1321 = vmatmul.mubr.msk.f32.vlgmr.msra.gmra.mrb[6].mxu1 %vm225_vm6, %v844_v51 }
 0x24d   :  { %1403 = vmatpush3.bf16.msk.msra.mxu1 %vm1808_vm4, %v1823_v11  ;;  %1327 = vmatprep.mubr.msk.f32.mxu1 %vm1639_vm0, %v1640_v1 }
 0x24e   :  { %1410 = vmatprep.subr.bf16.mxu1 %v1638_v0 }
 0x254   :  { %1328 = vmatmul.mubr.msk.f32.vlgmr.msra.gmra.mrb[6].mxu1 %vm225_vm6, %v920_v52 }
 0x255   :  { %1412 = vmatpush3.bf16.msra.mxu1 %v1847_v23  ;;  %1349 = vmatprep.mubr.msk.f32.mxu1 %vm1639_vm0, %v1640_v1 }
 0x256   :  { %1413 = vmatprep.subr.bf16.mxu1 %v1638_v0 }
 0x259   :  { %1415 = vmatpush3.bf16.msra.mxu1 %v1374_v40 }
 0x30f   :  { %v535_v53 = vpop.f32.mrb[2].mxu1 }
 0x310   :  { %v1279_v54 = vpop.f32.mrb[3].mxu1  ;;  %v536_v3 = vadd.f32 %v535_v53, %v465_v2 }
 0x31b   :  { %v763_v55 = vpop.f32.mrb[4].mxu1 }
 0x31c   :  { %v764_v56 = vadd.f32 %v763_v55, %v386_v42  ;;  %v1304_v57 = vpop.f32.mrb[5].mxu1 }
 0x31e   :  { %v767_v58 = vmax.f32 %v764_v56, 0.0 }
 0x320   :  { %1314 = vmatmul.mubr.msk.f32.vlgmr.msra.gmra.mrb[6].mxu0 %vm387_vm8, %v767_v58 }
 0x321   :  { %1406 = vmatpush3.bf16.msra.mxu0 %v1839_v17  ;;  %1338 = vmatprep.mubr.msk.f32.mxu0 %vm1639_vm0, %v1640_v1  ;;  %v539_v1 = vmax.f32 %v536_v3, 0.0 }
 0x322   :  { %1407 = vmatprep.subr.bf16.mxu0 %v1638_v0 }
 0x325   :  { %1409 = vmatpush3.bf16.msra.mxu0 %v1843_v20 }
 0x327   :  { %v990_v59 = vpop.f32.mrb[6].mxu1 }
 0x328   :  { %v1418_v60 = vadd.f32 %v990_v59, %v1860_v31  ;;  %v1329_v61 = vpop.f32.mrb[7].mxu1 }
 0x32a   :  { %v995_v62 = vmax.f32 %v1418_v60, 0.0 }
 0x32c   :  { %1339 = vmatmul.mubr.msk.f32.vlgmr.msra.gmra.mrb[8].mxu0 %vm387_vm8, %v995_v62 }
 0x3f3   :  { %v837_v4 = vpop.f32.mrb[6].mxu0 }
 0x3f4   :  { %v838_v5 = vadd.f32 %v837_v4, %v465_v2  ;;  %v1315_v6 = vpop.f32.mrb[7].mxu0 }
 0x3f6   :  { %v841_v7 = vmax.f32 %v838_v5, 0.0 }
 0x3f8   :  { %v842_v0 = vadd.f32 %v841_v7, %v539_v1 }
 0x3ff   :  { %v1065_v8 = vpop.f32.mrb[8].mxu0 }
 0x400   :  { %v1066_v9 = vadd.f32 %v1065_v8, %v386_v42  ;;  %v1340_v10 = vpop.f32.mrb[9].mxu0 }
 0x402   :  { %v1069_v11 = vmax.f32 %v1066_v9, 0.0 }
 0x404   :  { %1350 = vmatmul.mubr.msk.f32.vlgmr.msra.gmra.mrb[8].mxu1 %vm387_vm8, %v1069_v11 }
 0x4d7   :  { %v1139_v12 = vpop.f32.mrb[8].mxu1 }
 0x4d8   :  { %v1140_v13 = vadd.f32 %v1139_v12, %v465_v2  ;;  %v1351_v14 = vpop.f32.mrb[9].mxu1 }
 0x4da   :  { %v1143_v15 = vmax.f32 %v1140_v13, 0.0 }
 0x4dc   :  { %v1144_v16 = vadd.f32 %v1143_v15, %v842_v0 }
 0x4de   :  { %v1145_v17 = vmul.f32 0.33333334, %v1144_v16 }
 0x4e0   :  { %1147 = vst.msk [vmem:[#allocation14] sm:$0xf] %vm1146_vm9, %v1145_v17 }
 0x4e1   :  { %1606 = shalt.err (!%p1603_p4)
}
 0x4e2   :  { %s1607_s17 = scalar_lea.hbm %s1945_s9, 64 }
 0x4e3   :  { %p1608_p5 = scmp.ne.s32.totalorder %s1945_s9, %s1607_s17  ;;  %p1611_p6 = scmp.lt.u32.totalorder %s1607_s17, %s1945_s9 }
 0x4e5   :  { %p1613_p7 = pnand %p1611_p6, %p1608_p5 }
 0x4e7   :  { %1616 = shalt.err (!%p1613_p7)
}
 0x4e8   :  { %1157 = dma.vmem_to_hbm [thread:$0]  %s1155_s12, 64, %s1945_s9, [#allocation4]  }
 0x4e9   :  { %1625 = dma.done.wait [#allocation4], 64  }
 0x4ea   :  { %1626 = vsyncadd [#allocation4], 4294967232 }
 0x4eb   :  { %1161 = vsyncpa [#allocation3], 1 }
 0x4ec   :  { %1162 = vsyncpa [#allocation6], 1 }
 0x4ed   :  { %1163 = vsyncpa [#allocation9], 1 }
 0x4ee   :  { %1164 = vsyncpa [#allocation12], 1 }
 0x4ef   :  { %1165 = vsyncpa [#allocation4], 1 }

</bundles_post_ra>
